<compile_context>
chip_gen: v5e
topology: v5e:2x2
jax: 0.10.0
libtpu: 0.0.40
codegen_flags: <defaults>
</compile_context>

<pallas_src>
import jax
import jax.numpy as jnp
from jax.experimental import pallas as pl
from jax.experimental.pallas import tpu as pltpu

# Logical (PyTorch) layer widths.
D_IN, D_H1, D_H2, D_H3, D_OUT = 52, 10, 4 * 4 * 13, 64, 10

LANE = 128


def _round_up(n, m):
    return ((n + m - 1) // m) * m


# Hidden widths are lane-padded (zero-padded weights/biases keep the math
# exact); input (52) and output (10) stay at their true widths.
D_H1_P = _round_up(D_H1, LANE)   # 128
D_H2_P = _round_up(D_H2, LANE)   # 256
D_H3_P = _round_up(D_H3, LANE)   # 128


def mlp_kernel(x_ref, w1_ref, b1_ref, w2_ref, b2_ref, w3_ref, b3_ref,
               w4_ref, b4_ref, o_ref):
    # Layer 1: tiny K=52 matmul kept in f32 (no cast of x needed; Mosaic masks
    # the unaligned contraction remainder).
    h = jnp.dot(x_ref[...], w1_ref[...],
                preferred_element_type=jnp.float32) + b1_ref[...]
    # ReLU in f32, then round to bf16 (order is equivalent for ReLU; f32 max is
    # safe on v5e which has no bf16 VALU).
    h = jnp.maximum(h, 0.0).astype(jnp.bfloat16)

    h = jnp.dot(h, w2_ref[...],
                preferred_element_type=jnp.float32) + b2_ref[...]
    h = jnp.maximum(h, 0.0).astype(jnp.bfloat16)

    h = jnp.dot(h, w3_ref[...],
                preferred_element_type=jnp.float32) + b3_ref[...]
    h = jnp.maximum(h, 0.0).astype(jnp.bfloat16)

    # Layer 4 emits only the 10 real logit columns -> no padded-logit masking.
    logits = jnp.dot(h, w4_ref[...],
                     preferred_element_type=jnp.float32) + b4_ref[...]

    # Numerically stable log_softmax along the feature axis (10 lanes).
    m = jnp.max(logits, axis=1, keepdims=True)
    shifted = logits - m
    lse = jnp.log(jnp.sum(jnp.exp(shifted), axis=1, keepdims=True))
    o_ref[...] = (shifted - lse).astype(o_ref.dtype)


def prepare_params(params):
    """One-time pad + cast of the weights/biases.

    Called once at init (NOT on the per-forward path).  Hidden dims are
    zero-padded to lane multiples; w1 keeps K=52, w4 keeps N=10.
    Layer 1 stays f32, layers 2-4 use bf16 weights; all biases stay f32.
    """
    w1, b1, w2, b2, w3, b3, w4, b4 = params

    def pw(w, din_p, dout_p, dtype):
        din, dout = w.shape
        wp = jnp.zeros((din_p, dout_p), dtype)
        return wp.at[:din, :dout].set(w.astype(dtype))

    def pb(b, dout_p):
        b = jnp.asarray(b, jnp.float32).reshape(1, -1)
        bp = jnp.zeros((1, dout_p), jnp.float32)
        return bp.at[:, :b.shape[1]].set(b)

    return (pw(w1, D_IN, D_H1_P, jnp.float32), pb(b1, D_H1_P),
            pw(w2, D_H1_P, D_H2_P, jnp.bfloat16), pb(b2, D_H2_P),
            pw(w3, D_H2_P, D_H3_P, jnp.bfloat16), pb(b3, D_H3_P),
            pw(w4, D_H3_P, D_OUT, jnp.bfloat16), pb(b4, D_OUT))


def mlp_forward(x, padded_params, *, tm=1024):
    """x: (B, 52) float32. padded_params: output of prepare_params()."""
    B = x.shape[0]
    x = x.astype(jnp.float32)

    # Batch tile: biggest tile up to `tm`, 8-row aligned, clamped to the batch.
    # No forced multi-step split: on 1-TC chips (v5e/v6e) extra steps only add
    # pipeline overhead; on v7x large batches already yield many parallel steps.
    tm_eff = min(_round_up(tm, 8), _round_up(B, 8))
    grid = (pl.cdiv(B, tm_eff),)   # Pallas masks the partial last block.

    pp = padded_params

    def const_spec(p):
        # Small resident tensors: same block every grid step (fetched once).
        return pl.BlockSpec(p.shape, lambda i: (0, 0))

    out = pl.pallas_call(
        mlp_kernel,
        out_shape=jax.ShapeDtypeStruct((B, D_OUT), jnp.float32),
        grid_spec=pltpu.PrefetchScalarGridSpec(
            num_scalar_prefetch=0,
            grid=grid,
            in_specs=[pl.BlockSpec((tm_eff, D_IN), lambda i: (i, 0))]
                     + [const_spec(p) for p in pp],
            out_specs=pl.BlockSpec((tm_eff, D_OUT), lambda i: (i, 0)),
        ),
        compiler_params=pltpu.CompilerParams(
            dimension_semantics=("parallel",)),
    )(x, *pp)

    return out


def init_params(key):
    ks = jax.random.split(key, 8)

    def lin(kw, kb, din, dout):
        # deterministic synthetic init (shapes match nn.Linear(din, dout))
        w = jax.random.normal(kw, (din, dout), jnp.float32) * 0.1
        b = jax.random.normal(kb, (1, dout), jnp.float32) * 0.1
        return w, b

    w1, b1 = lin(ks[0], ks[1], D_IN, D_H1)
    w2, b2 = lin(ks[2], ks[3], D_H1, D_H2)
    w3, b3 = lin(ks[4], ks[5], D_H2, D_H3)
    w4, b4 = lin(ks[6], ks[7], D_H3, D_OUT)
    return (w1, b1, w2, b2, w3, b3, w4, b4)


def mlp_reference(x, params):
    w1, b1, w2, b2, w3, b3, w4, b4 = params
    h = jnp.maximum(x @ w1 + b1, 0.0)
    h = jnp.maximum(h @ w2 + b2, 0.0)
    h = jnp.maximum(h @ w3 + b3, 0.0)
    logits = h @ w4 + b4
    return jax.nn.log_softmax(logits, axis=1)


if __name__ == "__main__":
    key = jax.random.PRNGKey(0)
    kp, kx = jax.random.split(key)
    params = init_params(kp)
    padded_params = prepare_params(params)   # one-time, outside the hot path

    B = 64
    x = jax.random.normal(kx, (B, D_IN), jnp.float32)

    out = mlp_forward(x, padded_params)
    out = jax.block_until_ready(out)

    ref = mlp_reference(x, params)
    assert out.shape == (B, D_OUT)
    # Layer 1 is f32; layers 2-4 use bf16 weights/activations (f32 accumulation)
    # vs the pure-f32 reference, hence the loose tolerance.
    assert jnp.allclose(out, ref, atol=5e-2, rtol=5e-2)

    print("KERNEL_OK")
</pallas_src>

<mosaic_0001>
module attributes {stable_mosaic.version = 11 : i64} {
  func.func @mlp_kernel(%arg0: i32, %arg1: memref<64x52xf32, #tpu.memory_space<vmem>>, %arg2: memref<52x128xf32, #tpu.memory_space<vmem>>, %arg3: memref<1x128xf32, #tpu.memory_space<vmem>>, %arg4: memref<128x256xbf16, #tpu.memory_space<vmem>>, %arg5: memref<1x256xf32, #tpu.memory_space<vmem>>, %arg6: memref<256x128xbf16, #tpu.memory_space<vmem>>, %arg7: memref<1x128xf32, #tpu.memory_space<vmem>>, %arg8: memref<128x10xbf16, #tpu.memory_space<vmem>>, %arg9: memref<1x10xf32, #tpu.memory_space<vmem>>, %arg10: memref<64x10xf32, #tpu.memory_space<vmem>>) attributes {dimension_semantics = [#tpu.dimension_semantics<parallel>], iteration_bounds = array<i64: 1>, scalar_prefetch = 0 : i64, scratch_operands = 0 : i64, tpu.core_type = #tpu.core_type<tc>, window_params = [{transform_indices = @transform_0, window_bounds = array<i64: 64, 52>}, {pipeline_mode = #tpu.pipeline_mode<synchronous>, transform_indices = @transform_1, window_bounds = array<i64: 52, 128>}, {pipeline_mode = #tpu.pipeline_mode<synchronous>, transform_indices = @transform_2, window_bounds = array<i64: 1, 128>}, {pipeline_mode = #tpu.pipeline_mode<synchronous>, transform_indices = @transform_3, window_bounds = array<i64: 128, 256>}, {pipeline_mode = #tpu.pipeline_mode<synchronous>, transform_indices = @transform_4, window_bounds = array<i64: 1, 256>}, {pipeline_mode = #tpu.pipeline_mode<synchronous>, transform_indices = @transform_5, window_bounds = array<i64: 256, 128>}, {pipeline_mode = #tpu.pipeline_mode<synchronous>, transform_indices = @transform_6, window_bounds = array<i64: 1, 128>}, {pipeline_mode = #tpu.pipeline_mode<synchronous>, transform_indices = @transform_7, window_bounds = array<i64: 128, 10>}, {pipeline_mode = #tpu.pipeline_mode<synchronous>, transform_indices = @transform_8, window_bounds = array<i64: 1, 10>}, {transform_indices = @transform_9, window_bounds = array<i64: 64, 10>}]} {
    %c0 = arith.constant 0 : index
    %c0_0 = arith.constant 0 : index
    %0 = vector.load %arg1[%c0, %c0_0] : memref<64x52xf32, #tpu.memory_space<vmem>>, vector<64x52xf32>
    %c0_1 = arith.constant 0 : index
    %c0_2 = arith.constant 0 : index
    %1 = vector.load %arg2[%c0_1, %c0_2] : memref<52x128xf32, #tpu.memory_space<vmem>>, vector<52x128xf32>
    %cst = arith.constant dense<0.000000e+00> : vector<64x128xf32>
    %2 = tpu.matmul %0, %1, %cst {dimension_numbers = #tpu.dot_dimension_numbers<[1], [0], [0], [1], [0, 0, 1, 1], [], []>} : vector<64x52xf32>, vector<52x128xf32>, vector<64x128xf32> -> vector<64x128xf32>
    %c0_3 = arith.constant 0 : index
    %c0_4 = arith.constant 0 : index
    %3 = vector.load %arg3[%c0_3, %c0_4] : memref<1x128xf32, #tpu.memory_space<vmem>>, vector<1x128xf32>
    %4 = vector.broadcast %3 : vector<1x128xf32> to vector<64x128xf32>
    %5 = arith.addf %2, %4 : vector<64x128xf32>
    %cst_5 = arith.constant 0.000000e+00 : f32
    %6 = vector.broadcast %cst_5 : f32 to vector<64x128xf32>
    %7 = arith.maximumf %5, %6 : vector<64x128xf32>
    %8 = arith.truncf %7 : vector<64x128xf32> to vector<64x128xbf16>
    %c0_6 = arith.constant 0 : index
    %c0_7 = arith.constant 0 : index
    %9 = vector.load %arg4[%c0_6, %c0_7] : memref<128x256xbf16, #tpu.memory_space<vmem>>, vector<128x256xbf16>
    %cst_8 = arith.constant dense<0.000000e+00> : vector<64x256xf32>
    %10 = tpu.matmul %8, %9, %cst_8 {dimension_numbers = #tpu.dot_dimension_numbers<[1], [0], [0], [1], [0, 0, 1, 1], [], []>} : vector<64x128xbf16>, vector<128x256xbf16>, vector<64x256xf32> -> vector<64x256xf32>
    %c0_9 = arith.constant 0 : index
    %c0_10 = arith.constant 0 : index
    %11 = vector.load %arg5[%c0_9, %c0_10] : memref<1x256xf32, #tpu.memory_space<vmem>>, vector<1x256xf32>
    %12 = vector.broadcast %11 : vector<1x256xf32> to vector<64x256xf32>
    %13 = arith.addf %10, %12 : vector<64x256xf32>
    %cst_11 = arith.constant 0.000000e+00 : f32
    %14 = vector.broadcast %cst_11 : f32 to vector<64x256xf32>
    %15 = arith.maximumf %13, %14 : vector<64x256xf32>
    %16 = arith.truncf %15 : vector<64x256xf32> to vector<64x256xbf16>
    %c0_12 = arith.constant 0 : index
    %c0_13 = arith.constant 0 : index
    %17 = vector.load %arg6[%c0_12, %c0_13] : memref<256x128xbf16, #tpu.memory_space<vmem>>, vector<256x128xbf16>
    %cst_14 = arith.constant dense<0.000000e+00> : vector<64x128xf32>
    %18 = tpu.matmul %16, %17, %cst_14 {dimension_numbers = #tpu.dot_dimension_numbers<[1], [0], [0], [1], [0, 0, 1, 1], [], []>} : vector<64x256xbf16>, vector<256x128xbf16>, vector<64x128xf32> -> vector<64x128xf32>
    %c0_15 = arith.constant 0 : index
    %c0_16 = arith.constant 0 : index
    %19 = vector.load %arg7[%c0_15, %c0_16] : memref<1x128xf32, #tpu.memory_space<vmem>>, vector<1x128xf32>
    %20 = vector.broadcast %19 : vector<1x128xf32> to vector<64x128xf32>
    %21 = arith.addf %18, %20 : vector<64x128xf32>
    %cst_17 = arith.constant 0.000000e+00 : f32
    %22 = vector.broadcast %cst_17 : f32 to vector<64x128xf32>
    %23 = arith.maximumf %21, %22 : vector<64x128xf32>
    %24 = arith.truncf %23 : vector<64x128xf32> to vector<64x128xbf16>
    %c0_18 = arith.constant 0 : index
    %c0_19 = arith.constant 0 : index
    %25 = vector.load %arg8[%c0_18, %c0_19] : memref<128x10xbf16, #tpu.memory_space<vmem>>, vector<128x10xbf16>
    %cst_20 = arith.constant dense<0.000000e+00> : vector<64x10xf32>
    %26 = tpu.matmul %24, %25, %cst_20 {dimension_numbers = #tpu.dot_dimension_numbers<[1], [0], [0], [1], [0, 0, 1, 1], [], []>} : vector<64x128xbf16>, vector<128x10xbf16>, vector<64x10xf32> -> vector<64x10xf32>
    %c0_21 = arith.constant 0 : index
    %c0_22 = arith.constant 0 : index
    %27 = vector.load %arg9[%c0_21, %c0_22] : memref<1x10xf32, #tpu.memory_space<vmem>>, vector<1x10xf32>
    %28 = vector.broadcast %27 : vector<1x10xf32> to vector<64x10xf32>
    %29 = arith.addf %26, %28 : vector<64x10xf32>
    %cst_23 = arith.constant dense<0xFF800000> : vector<64xf32>
    %30 = vector.multi_reduction <maximumf>, %29, %cst_23 [1] : vector<64x10xf32> to vector<64xf32>
    %31 = vector.shape_cast %30 : vector<64xf32> to vector<64x1xf32>
    %32 = vector.broadcast %31 : vector<64x1xf32> to vector<64x10xf32>
    %33 = arith.subf %29, %32 : vector<64x10xf32>
    %34 = math.exp %33 : vector<64x10xf32>
    %cst_24 = arith.constant dense<0.000000e+00> : vector<64xf32>
    %35 = vector.multi_reduction <add>, %34, %cst_24 [1] : vector<64x10xf32> to vector<64xf32>
    %36 = vector.shape_cast %35 : vector<64xf32> to vector<64x1xf32>
    %37 = math.log %36 : vector<64x1xf32>
    %38 = vector.broadcast %37 : vector<64x1xf32> to vector<64x10xf32>
    %39 = arith.subf %33, %38 : vector<64x10xf32>
    %c0_25 = arith.constant 0 : index
    %c0_26 = arith.constant 0 : index
    %40 = vector.load %arg10[%c0_25, %c0_26] : memref<64x10xf32, #tpu.memory_space<vmem>>, vector<64x10xf32>
    tpu.vector_store %arg10[%c0_25, %c0_26], %39 {strides = array<i32>} : memref<64x10xf32, #tpu.memory_space<vmem>>, vector<64x10xf32>,
    return
  }
  func.func @transform_0(%arg0: i32) -> (i32, i32) {
    %c0_i32 = arith.constant 0 : i32
    %c0_i32_0 = arith.constant 0 : i32
    return %arg0, %c0_i32 : i32, i32
  }
  func.func @transform_1(%arg0: i32) -> (i32, i32) {
    %c0_i32 = arith.constant 0 : i32
    %c0_i32_0 = arith.constant 0 : i32
    %c0_i32_1 = arith.constant 0 : i32
    return %c0_i32, %c0_i32_0 : i32, i32
  }
  func.func @transform_2(%arg0: i32) -> (i32, i32) {
    %c0_i32 = arith.constant 0 : i32
    %c0_i32_0 = arith.constant 0 : i32
    %c0_i32_1 = arith.constant 0 : i32
    return %c0_i32, %c0_i32_0 : i32, i32
  }
  func.func @transform_3(%arg0: i32) -> (i32, i32) {
    %c0_i32 = arith.constant 0 : i32
    %c0_i32_0 = arith.constant 0 : i32
    %c0_i32_1 = arith.constant 0 : i32
    return %c0_i32, %c0_i32_0 : i32, i32
  }
  func.func @transform_4(%arg0: i32) -> (i32, i32) {
    %c0_i32 = arith.constant 0 : i32
    %c0_i32_0 = arith.constant 0 : i32
    %c0_i32_1 = arith.constant 0 : i32
    return %c0_i32, %c0_i32_0 : i32, i32
  }
  func.func @transform_5(%arg0: i32) -> (i32, i32) {
    %c0_i32 = arith.constant 0 : i32
    %c0_i32_0 = arith.constant 0 : i32
    %c0_i32_1 = arith.constant 0 : i32
    return %c0_i32, %c0_i32_0 : i32, i32
  }
  func.func @transform_6(%arg0: i32) -> (i32, i32) {
    %c0_i32 = arith.constant 0 : i32
    %c0_i32_0 = arith.constant 0 : i32
    %c0_i32_1 = arith.constant 0 : i32
    return %c0_i32, %c0_i32_0 : i32, i32
  }
  func.func @transform_7(%arg0: i32) -> (i32, i32) {
    %c0_i32 = arith.constant 0 : i32
    %c0_i32_0 = arith.constant 0 : i32
    %c0_i32_1 = arith.constant 0 : i32
    return %c0_i32, %c0_i32_0 : i32, i32
  }
  func.func @transform_8(%arg0: i32) -> (i32, i32) {
    %c0_i32 = arith.constant 0 : i32
    %c0_i32_0 = arith.constant 0 : i32
    %c0_i32_1 = arith.constant 0 : i32
    return %c0_i32, %c0_i32_0 : i32, i32
  }
  func.func @transform_9(%arg0: i32) -> (i32, i32) {
    %c0_i32 = arith.constant 0 : i32
    %c0_i32_0 = arith.constant 0 : i32
    return %arg0, %c0_i32 : i32, i32
  }
}

</mosaic_0001>

<bundles_post_ra>
// kernel: tpu_custom_call.1
= control target key start
LH: loop header
LB: loop body
LE: loop exit
PB: predicated region body
PF: predicated region fallthrough
CT: control target
= control target key end

     0   :  { %14 = vsyncpa [#allocation3], 0  ;;  %s1378_s0 = inlined_call_operand.vmem [shape: f32[64,52], index: 0, kind: input, shape index: {}]   ;;  %s1379_s1 = inlined_call_operand.vmem [shape: f32[52,128], index: 1, kind: input, shape index: {}]   ;;  %s1380_s2 = inlined_call_operand.hbm [shape: f32[1,128], index: 2, kind: input, shape index: {}]   ;;  %s1381_s3 = inlined_call_operand.vmem [shape: bf16[128,256], index: 3, kind: input, shape index: {}]   ;;  %s1382_s4 = inlined_call_operand.vmem [shape: f32[1,256], index: 4, kind: input, shape index: {}]   ;;  %s1383_s5 = inlined_call_operand.hbm [shape: bf16[256,128], index: 5, kind: input, shape index: {}]   ;;  %s1384_s6 = inlined_call_operand.vmem [shape: f32[1,128], index: 6, kind: input, shape index: {}]   ;;  %s1385_s7 = inlined_call_operand.vmem [shape: bf16[128,10], index: 7, kind: input, shape index: {}]   ;;  %s1386_s8 = inlined_call_operand.vmem [shape: f32[1,10], index: 8, kind: input, shape index: {}]   ;;  %s1387_s9 = inlined_call_operand.vmem [shape: f32[64,10], index: 9, kind: output, shape index: {}]  }
   0x1   :  { %s25_s11 = sshll.u32 %s1380_s2, 4  ;;  %s26_s11 = int_to_ptr.hbm [resolvable:$true] %s25_s11 }
   0x2   :  { %15 = vsyncpa [#allocation5], 0  ;;  %s1072_s12 = smov [#allocation2]   ;;  %s39_s16 = sshll.u32 %s1383_s5, 4  ;;  %s40_s16 = int_to_ptr.hbm [resolvable:$true] %s39_s16 }
   0x3   :  { %s27_s13 = sshll.u32 %s1072_s12, 4  ;;  %s1073_s17 = smov [#allocation4]   ;;  %s28_s13 = int_to_ptr.vmem [resolvable:$true] %s27_s13 }
   0x4   :  { %30 = dma.hbm_to_vmem [thread:$0]  %s26_s11, 16, %s28_s13, [#allocation3]  }
   0x5   :  { %s41_s18 = sshll.u32 %s1073_s17, 4  ;;  %s1074_s19 = smov 64   ;;  %s42_s18 = int_to_ptr.vmem [resolvable:$true] %s41_s18 }
   0x6   :  { %s1075_s20 = smov 4  }
   0x7   :  { %47 = dma.hbm_to_vmem [thread:$0]  %s40_s16, 2048, %s42_s18, [#allocation5], %s1074_s19, %s1074_s19, %s1075_s20  }
   0x8   :  { %1068 = dma.done.wait [#allocation3], 16  }
   0x9   :  { %1069 = vsyncadd [#allocation3], 4294967280 }
   0xa   :  { %1070 = dma.done.wait [#allocation5], 2048  }
   0xb   :  { %1071 = vsyncadd [#allocation5], 4294965248  ;;  %vm106_vm0 = vcmask 1043456   ;;  %v76_v0 = vld [vmem:[%s1379_s1 + $0x30] sm:$0xf]  ;;  %v75_v1 = vld [vmem:[%s1379_s1 + $0x28] sm:$0xff] }
   0xc   :  { %757 = vmatpush.msk.msra.mxu0 %vm106_vm0, %v76_v0  ;;  %966 = vmatpush.msk.msra.mxu3 %vm106_vm0, %v76_v0  ;;  %v74_v2 = vld [vmem:[%s1379_s1 + $0x20] sm:$0xff]  ;;  %v73_v3 = vld [vmem:[%s1379_s1 + $0x18] sm:$0xff]  ;;  %v72_v4 = vld [vmem:[%s1379_s1 + $0x10] sm:$0xff]  ;;  %vm81_vm1 = vcmask 424960   ;;  %vm646_vm2 = vcmask 80896  }
   0xd   :  { %v824_v5 = vld [vmem:[%s1381_s3 + $0x70] sm:$0xf]  ;;  %v941_v6 = vld [vmem:[%s1381_s3 + $0x74] sm:$0xf0]  ;;  %v71_v8 = vld [vmem:[%s1379_s1 + $0x8] sm:$0xff] }
   0xe   :  { %120 = vmatpush.msra.mxu0 %v75_v1  ;;  %967 = vmatpush.msra.mxu3 %v75_v1  ;;  %v825_v7 = vor.u32 %v941_v6, %v824_v5  ;;  %v816_v9 = vld [vmem:[%s1381_s3 + $0x60] sm:$0xf]  ;;  %v939_v10 = vld [vmem:[%s1381_s3 + $0x64] sm:$0xf0]  ;;  %v808_v15 = vld [vmem:[%s1381_s3 + $0x50] sm:$0xf] }
   0xf   :  { %v70_v11 = vld [vmem:[%s1379_s1] sm:$0xff]  ;;  %v817_v14 = vor.u32 %v939_v10, %v816_v9  ;;  %v937_v16 = vld [vmem:[%s1381_s3 + $0x54] sm:$0xf0]  ;;  %v935_v19 = vld [vmem:[%s1381_s3 + $0x44] sm:$0xf0] }
  0x10   :  { %121 = vmatpush.msra.mxu0 %v74_v2  ;;  %968 = vmatpush.msra.mxu3 %v74_v2  ;;  %v62_v12 = vld [vmem:[%s1378_s0] sm:$0xff]  ;;  %v809_v17 = vor.u32 %v937_v16, %v808_v15  ;;  %v63_v20 = vld [vmem:[%s1378_s0 + $0x8] sm:$0xff]  ;;  %v64_v23 = vld [vmem:[%s1378_s0 + $0x10] sm:$0xff] }
  0x11   :  { %265 = vmatpush.bf16.msra.mxu1 %v825_v7  ;;  %973 = vmatpush.bf16.msra.mxu2 %v825_v7  ;;  %v66_v13 = vld [vmem:[%s1378_s0 + $0x20] sm:$0xff]  ;;  %v67_v21 = vld [vmem:[%s1378_s0 + $0x28] sm:$0xff]  ;;  %v68_v24 = vld [vmem:[%s1378_s0 + $0x30] sm:$0xff] }
  0x12   :  { %122 = vmatpush.msra.mxu0 %v73_v3  ;;  %969 = vmatpush.msra.mxu3 %v73_v3  ;;  %v800_v18 = vld [vmem:[%s1381_s3 + $0x40] sm:$0xf]  ;;  %v65_v25 = vld [vmem:[%s1378_s0 + $0x18] sm:$0xff]  ;;  %v792_v27 = vld [vmem:[%s1381_s3 + $0x30] sm:$0xf] }
  0x13   :  { %v801_v22 = vor.u32 %v935_v19, %v800_v18  ;;  %v69_v26 = vld [vmem:[%s1378_s0 + $0x38] sm:$0xff]  ;;  %v784_v30 = vld [vmem:[%s1381_s3 + $0x20] sm:$0xf]  ;;  %v931_v31 = vld [vmem:[%s1381_s3 + $0x24] sm:$0xf0] }
  0x14   :  { %123 = vmatpush.msra.mxu0 %v72_v4  ;;  %970 = vmatpush.msra.mxu3 %v72_v4  ;;  %v933_v28 = vld [vmem:[%s1381_s3 + $0x34] sm:$0xf0]  ;;  %v785_v32 = vor.u32 %v931_v31, %v784_v30  ;;  %v776_v33 = vld [vmem:[%s1381_s3 + $0x10] sm:$0xf]  ;;  %v768_v36 = vld [vmem:[%s1381_s3] sm:$0xf] }
  0x15   :  { %266 = vmatpush.bf16.msra.mxu1 %v817_v14  ;;  %974 = vmatpush.bf16.msra.mxu2 %v817_v14  ;;  %v793_v29 = vor.u32 %v933_v28, %v792_v27  ;;  %v929_v34 = vld [vmem:[%s1381_s3 + $0x14] sm:$0xf0]  ;;  %v927_v37 = vld [vmem:[%s1381_s3 + $0x4] sm:$0xf0]  ;;  %v940_v39 = vld [vmem:[%s1381_s3 + $0x74] sm:$0xf] }
  0x16   :  { %124 = vmatpush.msra.mxu0 %v71_v8  ;;  %971 = vmatpush.msra.mxu3 %v71_v8  ;;  %v777_v35 = vor.u32 %v929_v34, %v776_v33  ;;  %v769_v38 = vor.u32 %v927_v37, %v768_v36  ;;  %v826_v40 = vld [vmem:[%s1381_s3 + $0x78] sm:$0xf0]  ;;  %v938_v42 = vld [vmem:[%s1381_s3 + $0x64] sm:$0xf]  ;;  %v818_v43 = vld [vmem:[%s1381_s3 + $0x68] sm:$0xf0] }
  0x17   :  { %v829_v41 = vor.u32 %v940_v39, %v826_v40  ;;  %v821_v44 = vor.u32 %v938_v42, %v818_v43  ;;  %v936_v45 = vld [vmem:[%s1381_s3 + $0x54] sm:$0xf]  ;;  %v810_v46 = vld [vmem:[%s1381_s3 + $0x58] sm:$0xf0]  ;;  %v934_v48 = vld [vmem:[%s1381_s3 + $0x44] sm:$0xf] }
  0x18   :  { %125 = vmatpush.msra.mxu0 %v70_v11  ;;  %972 = vmatpush.msra.mxu3 %v70_v11  ;;  %v813_v47 = vor.u32 %v936_v45, %v810_v46  ;;  %v802_v49 = vld [vmem:[%s1381_s3 + $0x48] sm:$0xf0]  ;;  %v985_v52 = vld [vmem:[#allocation2] ss:$0 sm:$0xff]  ;;  %v932_v53 = vld [vmem:[%s1381_s3 + $0x34] sm:$0xf] }
  0x19   :  { %758 = vmatmul.msk.f32.vlgmr.msra.gmra.mxu0 %vm81_vm1, %v62_v12  ;;  %762 = vmatmul.msk.f32.vlgmr.msra.gmra.mxu3 %vm81_vm1, %v66_v13  ;;  %v805_v51 = vor.u32 %v934_v48, %v802_v49  ;;  %v794_v54 = vld [vmem:[%s1381_s3 + $0x38] sm:$0xf0]  ;;  %v930_v57 = vld [vmem:[%s1381_s3 + $0x24] sm:$0xf]  ;;  %v786_v58 = vld [vmem:[%s1381_s3 + $0x28] sm:$0xf0] }
  0x1a   :  { %267 = vmatpush.bf16.msra.mxu1 %v809_v17  ;;  %975 = vmatpush.bf16.msra.mxu2 %v809_v17  ;;  %v797_v55 = vor.u32 %v932_v53, %v794_v54  ;;  %v789_v60 = vor.u32 %v930_v57, %v786_v58  ;;  %v928_v61 = vld [vmem:[%s1381_s3 + $0x14] sm:$0xf]  ;;  %v778_v62 = vld [vmem:[%s1381_s3 + $0x18] sm:$0xf0]  ;;  %v926_v4 = vld [vmem:[%s1381_s3 + $0x4] sm:$0xf] }
  0x1b   :  { %v781_v2 = vor.u32 %v928_v61, %v778_v62  ;;  %v770_v5 = vld [vmem:[%s1381_s3 + $0x8] sm:$0xf0]  ;;  %v949_v28 = vld [vmem:[#allocation4 + $0x38] sm:$0xff]  ;;  %v946_v31 = vld [vmem:[#allocation4 + $0x20] sm:$0xff] }
  0x1c   :  { %v773_v9 = vor.u32 %v926_v4, %v770_v5  ;;  %479 = vmatpush.bf16.msrb.mxu3 %v949_v28  ;;  %v947_v30 = vld [vmem:[#allocation4 + $0x28] sm:$0xff]  ;;  %v944_v33 = vld [vmem:[#allocation4 + $0x10] sm:$0xff]  ;;  %v957_v36 = vld [vmem:[#allocation4 + $0x78] sm:$0xff] }
  0x1d   :  { %v943_v34 = vld [vmem:[#allocation4 + $0x8] sm:$0xff]  ;;  %508 = vmatpush.bf16.msrb.mxu0 %v957_v36  ;;  %v179_v37 = vld [vmem:[%s1382_s4] sm:$0x3]  ;;  %v954_v43 = vld [vmem:[#allocation4 + $0x60] sm:$0xff] }
  0x1e   :  { %268 = vmatpush.bf16.msra.mxu1 %v801_v22  ;;  %976 = vmatpush.bf16.msra.mxu2 %v801_v22  ;;  %v955_v40 = vld [vmem:[#allocation4 + $0x68] sm:$0xff]  ;;  %v953_v45 = vld [vmem:[#allocation4 + $0x58] sm:$0xff] }
  0x1f   :  { %v951_v53 = vld [vmem:[#allocation4 + $0x48] sm:$0xff] }
  0x21   :  { %759 = vmatmul.msk.f32.gmra.mxu0 %vm81_vm1, %v63_v20  ;;  %763 = vmatmul.msk.f32.gmra.mxu3 %vm81_vm1, %v67_v21 }
  0x22   :  { %269 = vmatpush.bf16.msra.mxu1 %v793_v29  ;;  %977 = vmatpush.bf16.msra.mxu2 %v793_v29  ;;  %v948_v29 = vld [vmem:[#allocation4 + $0x30] sm:$0xff] }
  0x23   :  { %480 = vmatpush.bf16.msrb.mxu3 %v948_v29 }
  0x26   :  { %270 = vmatpush.bf16.msra.mxu1 %v785_v32  ;;  %978 = vmatpush.bf16.msra.mxu2 %v785_v32  ;;  %v945_v32 = vld [vmem:[#allocation4 + $0x18] sm:$0xff] }
  0x27   :  { %481 = vmatpush.bf16.msrb.mxu3 %v947_v30 }
  0x29   :  { %760 = vmatmul.msk.f32.gmra.mxu0 %vm81_vm1, %v64_v23  ;;  %764 = vmatmul.msk.f32.gmra.mxu3 %vm81_vm1, %v68_v24 }
  0x2a   :  { %271 = vmatpush.bf16.msra.mxu1 %v777_v35  ;;  %979 = vmatpush.bf16.msra.mxu2 %v777_v35  ;;  %v942_v35 = vld [vmem:[#allocation4] sm:$0xff] }
  0x2b   :  { %482 = vmatpush.bf16.msrb.mxu3 %v946_v31 }
  0x2e   :  { %272 = vmatpush.bf16.msra.mxu1 %v769_v38  ;;  %980 = vmatpush.bf16.msra.mxu2 %v769_v38  ;;  %v956_v38 = vld [vmem:[#allocation4 + $0x70] sm:$0xff] }
  0x2f   :  { %483 = vmatpush.bf16.msrb.mxu3 %v945_v32  ;;  %509 = vmatpush.bf16.msrb.mxu0 %v956_v38 }
  0x31   :  { %761 = vmatmul.msk.f32.gmra.mxu0 %vm81_vm1, %v65_v25  ;;  %765 = vmatmul.msk.f32.gmra.mxu3 %vm81_vm1, %v69_v26 }
  0x32   :  { %294 = vmatpush.bf16.msrb.mxu2 %v829_v41  ;;  %v181_v41 = vperm.slane %v179_v37, 0 }
  0x33   :  { %484 = vmatpush.bf16.msrb.mxu3 %v944_v33  ;;  %510 = vmatpush.bf16.msrb.mxu0 %v955_v40  ;;  %v964_v40 = vld [vmem:[%s1385_s7 + $0x30] sm:$0xff] }
  0x36   :  { %295 = vmatpush.bf16.msrb.mxu2 %v821_v44 }
  0x37   :  { %485 = vmatpush.bf16.msrb.mxu3 %v943_v34  ;;  %511 = vmatpush.bf16.msrb.mxu0 %v954_v43  ;;  %v961_v43 = vld [vmem:[%s1385_s7 + $0x18] sm:$0xff] }
  0x3a   :  { %296 = vmatpush.bf16.msrb.mxu2 %v813_v47 }
  0x3b   :  { %486 = vmatpush.bf16.msrb.mxu3 %v942_v35  ;;  %512 = vmatpush.bf16.msrb.mxu0 %v953_v45  ;;  %v959_v45 = vld [vmem:[%s1385_s7 + $0x8] sm:$0xff] }
  0x3e   :  { %297 = vmatpush.bf16.msrb.mxu2 %v805_v51  ;;  %v952_v51 = vld [vmem:[#allocation4 + $0x50] sm:$0xff] }
  0x3f   :  { %513 = vmatpush.bf16.msrb.mxu0 %v952_v51 }
  0x42   :  { %298 = vmatpush.bf16.msrb.mxu2 %v797_v55 }
  0x43   :  { %514 = vmatpush.bf16.msrb.mxu0 %v951_v53 }
  0x46   :  { %299 = vmatpush.bf16.msrb.mxu2 %v789_v60 }
  0x4a   :  { %300 = vmatpush.bf16.msrb.mxu2 %v781_v2 }
  0x4e   :  { %301 = vmatpush.bf16.msrb.mxu2 %v773_v9 }
  0x96   :  { %v127_v50 = vpop.f32.mrf.mxu0 }
  0x97   :  { %v128_v56 = vadd.f32 %v985_v52, %v127_v50 }
  0x99   :  { %v151_v0 = vmax.f32 %v128_v56, 0.0  ;;  %v950_v56 = vld [vmem:[#allocation4 + $0x40] sm:$0xff] }
  0x9a   :  { %515 = vmatpush.bf16.msrb.mxu0 %v950_v56 }
  0x9c   :  { %v139_v59 = vpop.f32.mrf.mxu3 }
  0x9d   :  { %v140_v6 = vadd.f32 %v985_v52, %v139_v59 }
  0x9e   :  { %v130_v63 = vpop.f32.mrf.mxu0 }
  0x9f   :  { %v131_v1 = vadd.f32 %v985_v52, %v130_v63  ;;  %v155_v12 = vmax.f32 %v140_v6, 0.0  ;;  %v182_v6 = vperm.slane %v179_v37, 1 }
  0xa1   :  { %v152_v3 = vmax.f32 %v131_v1, 0.0 }
  0xa3   :  { %v159_v7 = vpack.c.bf16 %v152_v3, %v151_v0 }
  0xa4   :  { %v142_v8 = vpop.f32.mrf.mxu3 }
  0xa5   :  { %v143_v10 = vadd.f32 %v985_v52, %v142_v8  ;;  %273 = vmatmul.bf16.vlgmr.msra.gmra.mxu1 %v159_v7 }
  0xa6   :  { %v133_v11 = vpop.f32.mrf.mxu0 }
  0xa7   :  { %v156_v13 = vmax.f32 %v143_v10, 0.0  ;;  %v134_v15 = vadd.f32 %v985_v52, %v133_v11 }
  0xa9   :  { %v161_v14 = vpack.c.bf16 %v156_v13, %v155_v12  ;;  %v153_v18 = vmax.f32 %v134_v15, 0.0 }
  0xab   :  { %283 = vmatmul.bf16.vlgmr.msra.gmra.mxu2 %v161_v14 }
  0xac   :  { %v145_v16 = vpop.f32.mrf.mxu3 }
  0xad   :  { %v146_v21 = vadd.f32 %v985_v52, %v145_v16 }
  0xae   :  { %v136_v17 = vpop.f32.mrf.mxu0 }
  0xaf   :  { %v137_v19 = vadd.f32 %v985_v52, %v136_v17  ;;  %v157_v25 = vmax.f32 %v146_v21, 0.0 }
  0xb1   :  { %v154_v20 = vmax.f32 %v137_v19, 0.0 }
  0xb3   :  { %v160_v22 = vpack.c.bf16 %v154_v20, %v153_v18 }
  0xb4   :  { %v148_v23 = vpop.f32.mrf.mxu3 }
  0xb5   :  { %v149_v24 = vadd.f32 %v985_v52, %v148_v23  ;;  %278 = vmatmul.bf16.gmra.mxu1 %v160_v22 }
  0xb7   :  { %v158_v26 = vmax.f32 %v149_v24, 0.0 }
  0xb9   :  { %v162_v27 = vpack.c.bf16 %v158_v26, %v157_v25 }
  0xbb   :  { %288 = vmatmul.bf16.gmra.mxu2 %v162_v27 }
  0xcb   :  { %302 = vmatmul.bf16.vlgmr.msrb.gmra.mxu2 %v159_v7 }
  0xdb   :  { %307 = vmatmul.bf16.gmra.mxu2 %v160_v22 }
  0xeb   :  { %312 = vmatmul.bf16.gmra.mxu2 %v161_v14 }
  0xfb   :  { %317 = vmatmul.bf16.gmra.mxu2 %v162_v27 }
 0x122   :  { %v274_v39 = vpop.f32.mrf.mxu1 }
 0x123   :  { %v275_v42 = vadd.f32 %v274_v39, %v181_v41  ;;  %v965_v39 = vld [vmem:[%s1385_s7 + $0x38] sm:$0xff] }
 0x124   :  { %617 = vmatpush.bf16.msrb.mxu1 %v965_v39 }
 0x125   :  { %v323_v46 = vmax.f32 %v275_v42, 0.0  ;;  %v962_v42 = vld [vmem:[%s1385_s7 + $0x20] sm:$0xff] }
 0x128   :  { %618 = vmatpush.bf16.msrb.mxu1 %v964_v40 }
 0x12a   :  { %v276_v44 = vpop.f32.mrf.mxu1 }
 0x12b   :  { %v277_v47 = vadd.f32 %v276_v44, %v181_v41  ;;  %v960_v44 = vld [vmem:[%s1385_s7 + $0x10] sm:$0xff] }
 0x12d   :  { %v325_v48 = vmax.f32 %v277_v47, 0.0 }
 0x12e   :  { %v284_v49 = vpop.f32.mrf.mxu2 }
 0x12f   :  { %v339_v50 = vpack.c.bf16 %v325_v48, %v323_v46  ;;  %v285_v1 = vadd.f32 %v284_v49, %v181_v41  ;;  %v958_v46 = vld [vmem:[%s1385_s7] sm:$0xff] }
 0x131   :  { %487 = vmatmul.bf16.vlgmr.msrb.gmra.mxu3 %v339_v50  ;;  %v331_v3 = vmax.f32 %v285_v1, 0.0  ;;  %v986_v50 = vld [vmem:[%s1384_s6] ss:$0 sm:$0xff] }
 0x132   :  { %v279_v52 = vpop.f32.mrf.mxu1 }
 0x133   :  { %v280_v55 = vadd.f32 %v279_v52, %v181_v41 }
 0x135   :  { %v327_v58 = vmax.f32 %v280_v55, 0.0 }
 0x136   :  { %v286_v54 = vpop.f32.mrf.mxu2 }
 0x137   :  { %v287_v0 = vadd.f32 %v286_v54, %v181_v41 }
 0x139   :  { %v333_v2 = vmax.f32 %v287_v0, 0.0 }
 0x13a   :  { %v281_v57 = vpop.f32.mrf.mxu1 }
 0x13b   :  { %v282_v59 = vadd.f32 %v281_v57, %v181_v41  ;;  %v343_v5 = vpack.c.bf16 %v333_v2, %v331_v3 }
 0x13d   :  { %v329_v60 = vmax.f32 %v282_v59, 0.0 }
 0x13e   :  { %v289_v61 = vpop.f32.mrf.mxu2 }
 0x13f   :  { %v341_v62 = vpack.c.bf16 %v329_v60, %v327_v58  ;;  %v290_v11 = vadd.f32 %v289_v61, %v181_v41 }
 0x141   :  { %492 = vmatmul.bf16.gmra.mxu3 %v341_v62  ;;  %v335_v16 = vmax.f32 %v290_v11, 0.0 }
 0x146   :  { %v291_v63 = vpop.f32.mrf.mxu2 }
 0x147   :  { %v292_v9 = vadd.f32 %v291_v63, %v181_v41  ;;  %v963_v41 = vld [vmem:[%s1385_s7 + $0x28] sm:$0xff] }
 0x148   :  { %619 = vmatpush.bf16.msrb.mxu1 %v963_v41 }
 0x149   :  { %v337_v14 = vmax.f32 %v292_v9, 0.0 }
 0x14b   :  { %v345_v18 = vpack.c.bf16 %v337_v14, %v335_v16 }
 0x14c   :  { %620 = vmatpush.bf16.msrb.mxu1 %v962_v42 }
 0x14e   :  { %v303_v4 = vpop.f32.mrf.mxu2 }
 0x14f   :  { %v304_v7 = vadd.f32 %v303_v4, %v182_v6 }
 0x150   :  { %621 = vmatpush.bf16.msrb.mxu1 %v961_v43 }
 0x151   :  { %497 = vmatmul.bf16.gmra.mxu3 %v343_v5  ;;  %v324_v12 = vmax.f32 %v304_v7, 0.0 }
 0x154   :  { %622 = vmatpush.bf16.msrb.mxu1 %v960_v44 }
 0x156   :  { %v305_v8 = vpop.f32.mrf.mxu2 }
 0x157   :  { %v306_v10 = vadd.f32 %v305_v8, %v182_v6 }
 0x158   :  { %623 = vmatpush.bf16.msrb.mxu1 %v959_v45 }
 0x159   :  { %v326_v13 = vmax.f32 %v306_v10, 0.0 }
 0x15b   :  { %v340_v15 = vpack.c.bf16 %v326_v13, %v324_v12 }
 0x15c   :  { %624 = vmatpush.bf16.msrb.mxu1 %v958_v46 }
 0x15d   :  { %516 = vmatmul.bf16.vlgmr.msrb.gmra.mxu0 %v340_v15 }
 0x15e   :  { %v308_v17 = vpop.f32.mrf.mxu2 }
 0x15f   :  { %v309_v19 = vadd.f32 %v308_v17, %v182_v6 }
 0x161   :  { %502 = vmatmul.bf16.gmra.mxu3 %v345_v18  ;;  %v328_v22 = vmax.f32 %v309_v19, 0.0 }
 0x166   :  { %v310_v20 = vpop.f32.mrf.mxu2 }
 0x167   :  { %v311_v21 = vadd.f32 %v310_v20, %v182_v6 }
 0x169   :  { %v330_v23 = vmax.f32 %v311_v21, 0.0 }
 0x16b   :  { %v342_v24 = vpack.c.bf16 %v330_v23, %v328_v22 }
 0x16d   :  { %521 = vmatmul.bf16.gmra.mxu0 %v342_v24 }
 0x16e   :  { %v313_v25 = vpop.f32.mrf.mxu2 }
 0x16f   :  { %v314_v26 = vadd.f32 %v313_v25, %v182_v6 }
 0x171   :  { %v332_v29 = vmax.f32 %v314_v26, 0.0 }
 0x176   :  { %v315_v27 = vpop.f32.mrf.mxu2 }
 0x177   :  { %v316_v28 = vadd.f32 %v315_v27, %v182_v6 }
 0x179   :  { %v334_v30 = vmax.f32 %v316_v28, 0.0  ;;  %v987_v28 = vld [vmem:[%s1386_s8] ss:$0 sm:$0xff] }
 0x17b   :  { %v344_v31 = vpack.c.bf16 %v334_v30, %v332_v29 }
 0x17d   :  { %526 = vmatmul.bf16.gmra.mxu0 %v344_v31 }
 0x17e   :  { %v318_v32 = vpop.f32.mrf.mxu2 }
 0x17f   :  { %v319_v33 = vadd.f32 %v318_v32, %v182_v6 }
 0x181   :  { %v336_v36 = vmax.f32 %v319_v33, 0.0 }
 0x186   :  { %v320_v34 = vpop.f32.mrf.mxu2 }
 0x187   :  { %v321_v35 = vadd.f32 %v320_v34, %v182_v6 }
 0x189   :  { %v338_v37 = vmax.f32 %v321_v35, 0.0 }
 0x18b   :  { %v346_v38 = vpack.c.bf16 %v338_v37, %v336_v36 }
 0x18d   :  { %531 = vmatmul.bf16.gmra.mxu0 %v346_v38 }
 0x1b4   :  { %v488_v47 = vpop.f32.mrf.mxu3 }
 0x1b5   :  { %v489_v52 = vadd.f32 %v986_v50, %v488_v47 }
 0x1bc   :  { %v490_v48 = vpop.f32.mrf.mxu3 }
 0x1bd   :  { %v491_v53 = vadd.f32 %v986_v50, %v490_v48 }
 0x1c4   :  { %v493_v51 = vpop.f32.mrf.mxu3 }
 0x1c5   :  { %v494_v62 = vadd.f32 %v986_v50, %v493_v51 }
 0x1cc   :  { %v495_v59 = vpop.f32.mrf.mxu3 }
 0x1cd   :  { %v496_v0 = vadd.f32 %v986_v50, %v495_v59 }
 0x1d4   :  { %v498_v63 = vpop.f32.mrf.mxu3 }
 0x1d5   :  { %v499_v9 = vadd.f32 %v986_v50, %v498_v63 }
 0x1da   :  { %v517_v49 = vpop.f32.mrf.mxu0 }
 0x1db   :  { %v518_v54 = vadd.f32 %v517_v49, %v489_v52 }
 0x1dc   :  { %v500_v7 = vpop.f32.mrf.mxu3 }
 0x1dd   :  { %v537_v57 = vmax.f32 %v518_v54, 0.0  ;;  %v501_v10 = vadd.f32 %v986_v50, %v500_v7 }
 0x1e2   :  { %v519_v55 = vpop.f32.mrf.mxu0 }
 0x1e3   :  { %v520_v56 = vadd.f32 %v519_v55, %v491_v53 }
 0x1e4   :  { %v503_v14 = vpop.f32.mrf.mxu3 }
 0x1e5   :  { %v538_v58 = vmax.f32 %v520_v56, 0.0  ;;  %v504_v20 = vadd.f32 %v986_v50, %v503_v14 }
 0x1e7   :  { %v545_v60 = vpack.c.bf16 %v538_v58, %v537_v57 }
 0x1e9   :  { %625 = vmatmul.bf16.vlgmr.msrb.gmra.mxu1 %v545_v60 }
 0x1ea   :  { %v522_v61 = vpop.f32.mrf.mxu0 }
 0x1eb   :  { %v523_v1 = vadd.f32 %v522_v61, %v494_v62 }
 0x1ec   :  { %v505_v19 = vpop.f32.mrf.mxu3 }
 0x1ed   :  { %v539_v4 = vmax.f32 %v523_v1, 0.0  ;;  %v506_v21 = vadd.f32 %v986_v50, %v505_v19 }
 0x1f2   :  { %v524_v2 = vpop.f32.mrf.mxu0 }
 0x1f3   :  { %v525_v3 = vadd.f32 %v524_v2, %v496_v0 }
 0x1f5   :  { %v540_v5 = vmax.f32 %v525_v3, 0.0 }
 0x1f7   :  { %v546_v6 = vpack.c.bf16 %v540_v5, %v539_v4 }
 0x1f9   :  { %630 = vmatmul.bf16.gmra.mxu1 %v546_v6 }
 0x1fa   :  { %v527_v8 = vpop.f32.mrf.mxu0 }
 0x1fb   :  { %v528_v11 = vadd.f32 %v527_v8, %v499_v9 }
 0x1fd   :  { %v541_v15 = vmax.f32 %v528_v11, 0.0 }
 0x202   :  { %v529_v12 = vpop.f32.mrf.mxu0 }
 0x203   :  { %v530_v13 = vadd.f32 %v529_v12, %v501_v10 }
 0x205   :  { %v542_v16 = vmax.f32 %v530_v13, 0.0 }
 0x207   :  { %v547_v17 = vpack.c.bf16 %v542_v16, %v541_v15 }
 0x209   :  { %635 = vmatmul.bf16.gmra.mxu1 %v547_v17 }
 0x20a   :  { %v532_v18 = vpop.f32.mrf.mxu0 }
 0x20b   :  { %v533_v22 = vadd.f32 %v532_v18, %v504_v20 }
 0x20d   :  { %v543_v25 = vmax.f32 %v533_v22, 0.0 }
 0x212   :  { %v534_v23 = vpop.f32.mrf.mxu0 }
 0x213   :  { %v535_v24 = vadd.f32 %v534_v23, %v506_v21 }
 0x215   :  { %v544_v26 = vmax.f32 %v535_v24, 0.0 }
 0x217   :  { %v548_v27 = vpack.c.bf16 %v544_v26, %v543_v25 }
 0x219   :  { %640 = vmatmul.bf16.gmra.mxu1 %v548_v27 }
 0x266   :  { %v626_v29 = vpop.f32.mrf.mxu1 }
 0x267   :  { %v627_v30 = vadd.f32 %v987_v28, %v626_v29 }
 0x269   :  { %v647_v31 = vsel %vm646_vm2, %v627_v30, -inf }
 0x26a   :  { %648 = vmax.xlane.f32.xlu0 %v647_v31 }
 0x26e   :  { %v628_v32 = vpop.f32.mrf.mxu1 }
 0x26f   :  { %v629_v33 = vadd.f32 %v987_v28, %v628_v32 }
 0x271   :  { %v650_v34 = vsel %vm646_vm2, %v629_v33, -inf }
 0x272   :  { %651 = vmax.xlane.f32.xlu0 %v650_v34 }
 0x276   :  { %v631_v35 = vpop.f32.mrf.mxu1 }
 0x277   :  { %v632_v36 = vadd.f32 %v987_v28, %v631_v35 }
 0x279   :  { %v653_v37 = vsel %vm646_vm2, %v632_v36, -inf }
 0x27a   :  { %654 = vmax.xlane.f32.xlu1 %v653_v37 }
 0x27e   :  { %v633_v38 = vpop.f32.mrf.mxu1 }
 0x27f   :  { %v634_v39 = vadd.f32 %v987_v28, %v633_v38 }
 0x281   :  { %v656_v40 = vsel %vm646_vm2, %v634_v39, -inf }
 0x282   :  { %657 = vmax.xlane.f32.xlu1 %v656_v40 }
 0x286   :  { %v636_v41 = vpop.f32.mrf.mxu1 }
 0x287   :  { %v637_v42 = vadd.f32 %v987_v28, %v636_v41 }
 0x289   :  { %v659_v43 = vsel %vm646_vm2, %v637_v42, -inf }
 0x28a   :  { %660 = vmax.xlane.f32.xlu2 %v659_v43 }
 0x28e   :  { %v638_v44 = vpop.f32.mrf.mxu1 }
 0x28f   :  { %v639_v45 = vadd.f32 %v987_v28, %v638_v44 }
 0x291   :  { %v662_v46 = vsel %vm646_vm2, %v639_v45, -inf }
 0x292   :  { %663 = vmax.xlane.f32.xlu2 %v662_v46 }
 0x296   :  { %v641_v47 = vpop.f32.mrf.mxu1 }
 0x297   :  { %v642_v48 = vadd.f32 %v987_v28, %v641_v47 }
 0x299   :  { %v665_v49 = vsel %vm646_vm2, %v642_v48, -inf }
 0x29a   :  { %666 = vmax.xlane.f32.xlu0 %v665_v49 }
 0x29e   :  { %v643_v50 = vpop.f32.mrf.mxu1 }
 0x29f   :  { %v644_v51 = vadd.f32 %v987_v28, %v643_v50 }
 0x2a1   :  { %v668_v52 = vsel %vm646_vm2, %v644_v51, -inf }
 0x2a2   :  { %669 = vmax.xlane.f32.xlu1 %v668_v52 }
 0x2dd   :  { %v649_v53 = vpop.xlane.xlu0 %648 }
 0x2de   :  { %v1322_v54 = vsub.f32 %v627_v30, %v649_v53 }
 0x2e0   :  { %v679_v55 = vmul.f32 1.442695, %v1322_v54 }
 0x2e2   :  { %988 = vpow2.f32 %v679_v55 }
 0x2e5   :  { %v652_v56 = vpop.xlane.xlu0 %651 }
 0x2e6   :  { %v1325_v57 = vsub.f32 %v629_v33, %v652_v56 }
 0x2e8   :  { %v989_v58 = vpop.eup %988  ;;  %v681_v59 = vmul.f32 1.442695, %v1325_v57 }
 0x2e9   :  { %v695_v60 = vsel %vm646_vm2, %v989_v58, 0.0 }
 0x2ea   :  { %990 = vpow2.f32 %v681_v59  ;;  %696 = vadd.xlane.f32.xlu2 %v695_v60 }
 0x2ed   :  { %v655_v61 = vpop.xlane.xlu1 %654 }
 0x2ee   :  { %v1329_v62 = vsub.f32 %v632_v36, %v655_v61 }
 0x2f0   :  { %v991_v63 = vpop.eup %990  ;;  %v683_v0 = vmul.f32 1.442695, %v1329_v62 }
 0x2f1   :  { %v698_v1 = vsel %vm646_vm2, %v991_v63, 0.0 }
 0x2f2   :  { %992 = vpow2.f32 %v683_v0  ;;  %699 = vadd.xlane.f32.xlu0 %v698_v1 }
 0x2f5   :  { %v658_v2 = vpop.xlane.xlu1 %657 }
 0x2f6   :  { %v1333_v3 = vsub.f32 %v634_v39, %v658_v2 }
 0x2f8   :  { %v993_v4 = vpop.eup %992  ;;  %v685_v5 = vmul.f32 1.442695, %v1333_v3 }
 0x2f9   :  { %v701_v6 = vsel %vm646_vm2, %v993_v4, 0.0 }
 0x2fa   :  { %994 = vpow2.f32 %v685_v5  ;;  %702 = vadd.xlane.f32.xlu1 %v701_v6 }
 0x2fd   :  { %v661_v7 = vpop.xlane.xlu2 %660 }
 0x2fe   :  { %v675_v8 = vsub.f32 %v637_v42, %v661_v7 }
 0x300   :  { %v995_v9 = vpop.eup %994  ;;  %v687_v10 = vmul.f32 1.442695, %v675_v8 }
 0x301   :  { %v704_v11 = vsel %vm646_vm2, %v995_v9, 0.0 }
 0x302   :  { %996 = vpow2.f32 %v687_v10  ;;  %705 = vadd.xlane.f32.xlu2 %v704_v11 }
 0x305   :  { %v664_v12 = vpop.xlane.xlu2 %663 }
 0x306   :  { %v676_v13 = vsub.f32 %v639_v45, %v664_v12 }
 0x308   :  { %v997_v14 = vpop.eup %996  ;;  %v689_v15 = vmul.f32 1.442695, %v676_v13 }
 0x309   :  { %v707_v16 = vsel %vm646_vm2, %v997_v14, 0.0 }
 0x30a   :  { %998 = vpow2.f32 %v689_v15  ;;  %708 = vadd.xlane.f32.xlu0 %v707_v16 }
 0x30d   :  { %v667_v17 = vpop.xlane.xlu0 %666 }
 0x30e   :  { %v677_v18 = vsub.f32 %v642_v48, %v667_v17 }
 0x310   :  { %v999_v19 = vpop.eup %998  ;;  %v691_v20 = vmul.f32 1.442695, %v677_v18 }
 0x311   :  { %v710_v21 = vsel %vm646_vm2, %v999_v19, 0.0 }
 0x312   :  { %1000 = vpow2.f32 %v691_v20  ;;  %711 = vadd.xlane.f32.xlu1 %v710_v21 }
 0x315   :  { %v670_v22 = vpop.xlane.xlu1 %669 }
 0x316   :  { %v678_v23 = vsub.f32 %v644_v51, %v670_v22 }
 0x318   :  { %v1001_v24 = vpop.eup %1000  ;;  %v693_v25 = vmul.f32 1.442695, %v678_v23 }
 0x319   :  { %v713_v26 = vsel %vm646_vm2, %v1001_v24, 0.0 }
 0x31a   :  { %1002 = vpow2.f32 %v693_v25  ;;  %714 = vadd.xlane.f32.xlu2 %v713_v26 }
 0x320   :  { %v1003_v27 = vpop.eup %1002 }
 0x321   :  { %v716_v28 = vsel %vm646_vm2, %v1003_v27, 0.0 }
 0x322   :  { %717 = vadd.xlane.f32.xlu0 %v716_v28 }
 0x35d   :  { %v697_v29 = vpop.xlane.xlu2 %696 }
 0x35e   :  { %1004 = vlog2.f32 %v697_v29 }
 0x364   :  { %v1005_v30 = vpop.eup %1004 }
 0x365   :  { %v720_v31 = vmul.f32 0.6931472, %v1005_v30  ;;  %v700_v32 = vpop.xlane.xlu0 %699 }
 0x366   :  { %1006 = vlog2.f32 %v700_v32 }
 0x367   :  { %v735_v33 = vsub.f32 %v1322_v54, %v720_v31 }
 0x369   :  { %743 = vst.msk [vmem:[%s1387_s9] sm:$0xff] %vm646_vm2, %v735_v33 }
 0x36c   :  { %v1007_v34 = vpop.eup %1006 }
 0x36d   :  { %v722_v35 = vmul.f32 0.6931472, %v1007_v34  ;;  %v703_v36 = vpop.xlane.xlu1 %702 }
 0x36e   :  { %1008 = vlog2.f32 %v703_v36 }
 0x36f   :  { %v736_v37 = vsub.f32 %v1325_v57, %v722_v35 }
 0x371   :  { %744 = vst.msk [vmem:[%s1387_s9 + $0x8] sm:$0xff] %vm646_vm2, %v736_v37 }
 0x374   :  { %v1009_v38 = vpop.eup %1008 }
 0x375   :  { %v724_v39 = vmul.f32 0.6931472, %v1009_v38  ;;  %v706_v40 = vpop.xlane.xlu2 %705 }
 0x376   :  { %1010 = vlog2.f32 %v706_v40 }
 0x377   :  { %v737_v41 = vsub.f32 %v1329_v62, %v724_v39 }
 0x379   :  { %745 = vst.msk [vmem:[%s1387_s9 + $0x10] sm:$0xff] %vm646_vm2, %v737_v41 }
 0x37c   :  { %v1011_v42 = vpop.eup %1010 }
 0x37d   :  { %v726_v43 = vmul.f32 0.6931472, %v1011_v42  ;;  %v709_v44 = vpop.xlane.xlu0 %708 }
 0x37e   :  { %1012 = vlog2.f32 %v709_v44 }
 0x37f   :  { %v738_v45 = vsub.f32 %v1333_v3, %v726_v43 }
 0x381   :  { %746 = vst.msk [vmem:[%s1387_s9 + $0x18] sm:$0xff] %vm646_vm2, %v738_v45 }
 0x384   :  { %v1013_v46 = vpop.eup %1012 }
 0x385   :  { %v728_v47 = vmul.f32 0.6931472, %v1013_v46  ;;  %v712_v48 = vpop.xlane.xlu1 %711 }
 0x386   :  { %1014 = vlog2.f32 %v712_v48 }
 0x387   :  { %v739_v49 = vsub.f32 %v675_v8, %v728_v47 }
 0x389   :  { %747 = vst.msk [vmem:[%s1387_s9 + $0x20] sm:$0xff] %vm646_vm2, %v739_v49 }
 0x38c   :  { %v1015_v50 = vpop.eup %1014 }
 0x38d   :  { %v730_v51 = vmul.f32 0.6931472, %v1015_v50  ;;  %v715_v52 = vpop.xlane.xlu2 %714 }
 0x38e   :  { %1016 = vlog2.f32 %v715_v52 }
 0x38f   :  { %v740_v53 = vsub.f32 %v676_v13, %v730_v51 }
 0x391   :  { %748 = vst.msk [vmem:[%s1387_s9 + $0x28] sm:$0xff] %vm646_vm2, %v740_v53 }
 0x394   :  { %v1017_v54 = vpop.eup %1016 }
 0x395   :  { %v732_v55 = vmul.f32 0.6931472, %v1017_v54  ;;  %v718_v56 = vpop.xlane.xlu0 %717 }
 0x396   :  { %1018 = vlog2.f32 %v718_v56 }
 0x397   :  { %v741_v57 = vsub.f32 %v677_v18, %v732_v55 }
 0x399   :  { %749 = vst.msk [vmem:[%s1387_s9 + $0x30] sm:$0xff] %vm646_vm2, %v741_v57 }
 0x39c   :  { %v1019_v58 = vpop.eup %1018 }
 0x39d   :  { %v734_v59 = vmul.f32 0.6931472, %v1019_v58 }
 0x39f   :  { %v742_v60 = vsub.f32 %v678_v23, %v734_v59 }
 0x3a1   :  { %750 = vst.msk [vmem:[%s1387_s9 + $0x38] sm:$0xff] %vm646_vm2, %v742_v60 }
 0x3a2   :  { %755 = vsyncpa [#allocation3], 1 }
 0x3a3   :  { %756 = vsyncpa [#allocation5], 1 }

</bundles_post_ra>
